<compile_context>
chip_gen: v5e
topology: v5e:2x2
jax: 0.10.0
libtpu: 0.0.40
codegen_flags: <defaults>
</compile_context>

<pallas_src>
import functools

import jax
import jax.numpy as jnp
from jax.experimental import pallas as pl
from jax.experimental.pallas import tpu as pltpu

_LANE = 128
_MIB = 1 << 20


def _round_up(n: int, m: int) -> int:
    return ((n + m - 1) // m) * m


# ------------------------------- kernels -----------------------------------


def _packed_linear_kernel(x_ref, wbd_ref, b_ref, o_ref):
    """Packed batch tile: k original rows share each 128-lane packed row.

    x_ref   : (TBp, k*D) VMEM  packed batch tile (auto double-buffered)
    wbd_ref : (k*D, k)   VMEM  block-diagonal weight (resident every step)
    b_ref   : (1, 1)     SMEM  scalar bias
    o_ref   : (TBp, k)   VMEM  k outputs per packed row
    """
    # One MXU matmul does both the elementwise multiply and the per-row
    # D-element reduction (the block-diagonal RHS keeps each packed row's
    # segments mapped to their own output column).  No XLU lane reduce needed.
    y = jnp.dot(x_ref[...], wbd_ref[...], preferred_element_type=jnp.float32)
    o_ref[...] = y + b_ref[0, 0]


def _rowsum_linear_kernel(x_ref, w_ref, b_ref, o_ref):
    """Fallback tile (D >= 128, or batch not divisible by the packing factor).

    x_ref : (TB, D) VMEM  batch tile
    w_ref : (1, D)  VMEM  weight row (PyTorch nn.Linear layout, resident)
    b_ref : (1, 1)  SMEM  scalar bias
    o_ref : (1, TB) VMEM  lane-dense output row
    """
    y = jnp.sum(x_ref[...].astype(jnp.float32) * w_ref[...], axis=-1)
    o_ref[...] = (y + b_ref[0, 0])[None, :]


# ------------------------------ tile sizing ---------------------------------


def _pick_rows_tile(rows, hbm_bytes_per_row, vmem_bytes_per_row,
                    target_block_bytes, vmem_budget_bytes):
    """Rows per grid step: multiple of 128, bytes-targeted, VMEM-capped."""
    if rows <= _LANE:
        return rows                                  # single (full-extent) tile
    # (1) carry enough HBM bytes per block to amortize ~0.35 us/step overhead.
    tb = _round_up(max(1, target_block_bytes // hbm_bytes_per_row), _LANE)
    # (2) lane-padding-aware VMEM cap (double-buffered input + output blocks).
    tb_cap = max(_LANE, (vmem_budget_bytes // vmem_bytes_per_row) // _LANE * _LANE)
    tb = min(tb, tb_cap)
    # (3) keep >=2 tiles so the "parallel" axis feeds both v7x TensorCores.
    tb = min(tb, max(_LANE, _round_up(pl.cdiv(rows, 2), _LANE)))
    # (4) never larger than the (rounded-up) row count.
    tb = min(tb, _round_up(rows, _LANE))
    return tb


# -------------------------------- wrapper -----------------------------------


@functools.partial(jax.jit,
                   static_argnames=("target_block_bytes", "vmem_budget_bytes"))
def lasso_regression_forward(x, weight, bias, *,
                             target_block_bytes=4 * _MIB,
                             vmem_budget_bytes=24 * _MIB):
    """Forward pass y = x @ weight.T + bias.

    x:      (batch, input_dim) float32 (bf16 accepted; promoted in-kernel)
    weight: (1, input_dim)     float32   (PyTorch nn.Linear layout)
    bias:   (1,)               float32
    returns (batch, 1)         float32

    vmem_budget_bytes=24 MiB is v7x-safe (64 MiB physical VMEM); on v5e/v6e
    (128 MiB VMEM) it can be raised for very large input_dim.
    """
    batch, d = x.shape
    w_row = weight.astype(jnp.float32).reshape(1, d)     # PyTorch (1, D) layout
    b2 = bias.astype(jnp.float32).reshape(1, 1)          # scalar -> SMEM
    # NOTE: x is deliberately NOT cast here; a wrapper-side astype is a full
    # extra HBM pass.  If x is bf16 upstream it is read as bf16 (half the HBM
    # bytes) and promoted inside the kernel.

    itemsize = x.dtype.itemsize
    # vmem_limit must cover the double-buffered blocks; follows the budget and
    # stays well under v7x's 64 MiB physical VMEM at the default settings.
    vmem_limit = max(32 * _MIB, vmem_budget_bytes + 8 * _MIB)
    compiler_params = pltpu.CompilerParams(
        dimension_semantics=("parallel",),      # shards tiles across v7x's 2 TCs
        vmem_limit_bytes=vmem_limit,
    )

    k = _LANE // d if d < _LANE else 1
    if k > 1 and batch % k == 0:
        # ---------------- packed path (D < 128) ---------------------------
        rows_p, pd = batch // k, k * d
        x_packed = x.reshape(rows_p, pd)        # free: data already contiguous
        # Block-diagonal weight (k*D, k): column j holds w in rows j*D:(j+1)*D.
        w_bd = (jnp.eye(k, dtype=jnp.float32)[:, None, :]
                * w_row.reshape(1, d, 1)).reshape(pd, k)

        # VMEM: in block pads to 128 lanes, out block (TBp, k) also pads to 128.
        vmem_per_row = 2 * _LANE * itemsize + 2 * _LANE * 4
        hbm_per_row = pd * itemsize + k * 4
        tb = _pick_rows_tile(rows_p, hbm_per_row, vmem_per_row,
                             target_block_bytes, vmem_budget_bytes)
        grid = (pl.cdiv(rows_p, tb),)           # ragged last block is masked

        out = pl.pallas_call(
            _packed_linear_kernel,
            out_shape=jax.ShapeDtypeStruct((rows_p, k), jnp.float32),
            grid=grid,
            in_specs=[
                # x: one packed batch tile per step (double-buffered DMA).
                # TODO(synk): optional pipeline_mode=pl.Buffered(3) sweep.
                pl.BlockSpec((tb, pd), lambda i: (i, 0)),
                # block-diagonal weight: same tiny block every step (resident).
                pl.BlockSpec((pd, k), lambda i: (0, 0)),
                # bias: scalar in SMEM.
                pl.BlockSpec(memory_space=pltpu.MemorySpace.SMEM),
            ],
            out_specs=pl.BlockSpec((tb, k), lambda i: (i, 0)),
            compiler_params=compiler_params,
        )(x_packed, w_bd, b2)
        return out.reshape(batch, 1)            # free reshape back to (batch, 1)

    # ---------------- fallback path (D >= 128 or batch % k != 0) ----------
    vmem_per_row = 2 * _round_up(d, _LANE) * itemsize + 2 * 8 * 4
    hbm_per_row = d * itemsize + 4
    tb = _pick_rows_tile(batch, hbm_per_row, vmem_per_row,
                         target_block_bytes, vmem_budget_bytes)
    grid = (pl.cdiv(batch, tb),)                # no jnp.pad: ragged block masked

    out_row = pl.pallas_call(
        _rowsum_linear_kernel,
        out_shape=jax.ShapeDtypeStruct((1, batch), jnp.float32),
        grid=grid,
        in_specs=[
            pl.BlockSpec((tb, d), lambda i: (i, 0)),
            pl.BlockSpec((1, d), lambda i: (0, 0)),
            pl.BlockSpec(memory_space=pltpu.MemorySpace.SMEM),
        ],
        out_specs=pl.BlockSpec((1, tb), lambda i: (0, i)),   # lane-dense row
        compiler_params=compiler_params,
    )(x, w_row, b2)
    return out_row.reshape(batch, 1)


if __name__ == "__main__":
    key = jax.random.PRNGKey(0)
    kw, kb, k1, k2, k3 = jax.random.split(key, 5)

    input_dim = 32                     # X_train.shape[1] stand-in
    bound = 1.0 / (input_dim ** 0.5)   # PyTorch nn.Linear default init range
    weight = jax.random.uniform(kw, (1, input_dim), minval=-bound, maxval=bound,
                                dtype=jnp.float32)
    bias = jax.random.uniform(kb, (1,), minval=-bound, maxval=bound,
                              dtype=jnp.float32)

    def ref(x):
        return jnp.sum(x * weight, axis=-1, keepdims=True) + bias

    # (1) packed path, single tile.
    x1 = jax.random.normal(k1, (64, input_dim), dtype=jnp.float32)
    y1 = jax.block_until_ready(lasso_regression_forward(x1, weight, bias))
    assert y1.shape == (64, 1)
    assert jnp.allclose(y1, ref(x1), atol=1e-4, rtol=1e-4)

    # (2) packed path, multiple tiles + ragged last block (small byte target
    #     only so a small demo batch still exercises the pipeline).
    x2 = jax.random.normal(k2, (4100, input_dim), dtype=jnp.float32)
    y2 = jax.block_until_ready(
        lasso_regression_forward(x2, weight, bias, target_block_bytes=128 * 1024))
    assert y2.shape == (4100, 1)
    assert jnp.allclose(y2, ref(x2), atol=1e-4, rtol=1e-4)

    # (3) fallback row-sum path: batch not divisible by the packing factor,
    #     multi-tile with a ragged last block (no wrapper padding).
    x3 = jax.random.normal(k3, (1001, input_dim), dtype=jnp.float32)
    y3 = jax.block_until_ready(
        lasso_regression_forward(x3, weight, bias, target_block_bytes=128 * 1024))
    assert y3.shape == (1001, 1)
    assert jnp.allclose(y3, ref(x3), atol=1e-4, rtol=1e-4)

    print("KERNEL_OK")
</pallas_src>

<mosaic_0001>
module attributes {stable_mosaic.version = 11 : i64} {
  func.func @_packed_linear_kernel(%arg0: i32, %arg1: memref<16x128xf32, #tpu.memory_space<vmem>>, %arg2: memref<128x4xf32, #tpu.memory_space<vmem>>, %arg3: memref<1x1xf32, #tpu.memory_space<smem>>, %arg4: memref<16x4xf32, #tpu.memory_space<vmem>>) attributes {dimension_semantics = [#tpu.dimension_semantics<parallel>], iteration_bounds = array<i64: 1>, scalar_prefetch = 0 : i64, scratch_operands = 0 : i64, tpu.core_type = #tpu.core_type<tc>, window_params = [{transform_indices = @transform_0, window_bounds = array<i64: 16, 128>}, {pipeline_mode = #tpu.pipeline_mode<synchronous>, transform_indices = @transform_1, window_bounds = array<i64: 128, 4>}, {transform_indices = @transform_2, window_bounds = array<i64: 1, 1>}, {transform_indices = @transform_3, window_bounds = array<i64: 16, 4>}]} {
    %c0 = arith.constant 0 : index
    %c0_0 = arith.constant 0 : index
    %0 = vector.load %arg1[%c0, %c0_0] : memref<16x128xf32, #tpu.memory_space<vmem>>, vector<16x128xf32>
    %c0_1 = arith.constant 0 : index
    %c0_2 = arith.constant 0 : index
    %1 = vector.load %arg2[%c0_1, %c0_2] : memref<128x4xf32, #tpu.memory_space<vmem>>, vector<128x4xf32>
    %cst = arith.constant dense<0.000000e+00> : vector<16x4xf32>
    %2 = tpu.matmul %0, %1, %cst {dimension_numbers = #tpu.dot_dimension_numbers<[1], [0], [0], [1], [0, 0, 1, 1], [], []>} : vector<16x128xf32>, vector<128x4xf32>, vector<16x4xf32> -> vector<16x4xf32>
    %c0_3 = arith.constant 0 : index
    %c0_4 = arith.constant 0 : index
    %3 = memref.load %arg3[%c0_3, %c0_4] : memref<1x1xf32, #tpu.memory_space<smem>>
    %4 = vector.broadcast %3 : f32 to vector<16x4xf32>
    %5 = arith.addf %2, %4 : vector<16x4xf32>
    %c0_5 = arith.constant 0 : index
    %c0_6 = arith.constant 0 : index
    %6 = vector.load %arg4[%c0_5, %c0_6] : memref<16x4xf32, #tpu.memory_space<vmem>>, vector<16x4xf32>
    tpu.vector_store %arg4[%c0_5, %c0_6], %5 {strides = array<i32>} : memref<16x4xf32, #tpu.memory_space<vmem>>, vector<16x4xf32>,
    return
  }
  func.func @transform_0(%arg0: i32) -> (i32, i32) {
    %c0_i32 = arith.constant 0 : i32
    %c0_i32_0 = arith.constant 0 : i32
    return %arg0, %c0_i32 : i32, i32
  }
  func.func @transform_1(%arg0: i32) -> (i32, i32) {
    %c0_i32 = arith.constant 0 : i32
    %c0_i32_0 = arith.constant 0 : i32
    %c0_i32_1 = arith.constant 0 : i32
    return %c0_i32, %c0_i32_0 : i32, i32
  }
  func.func @transform_2(%arg0: i32) -> (i32, i32) {
    %c0_i32 = arith.constant 0 : i32
    %c0_i32_0 = arith.constant 0 : i32
    %c0_i32_1 = arith.constant 0 : i32
    return %c0_i32, %c0_i32_0 : i32, i32
  }
  func.func @transform_3(%arg0: i32) -> (i32, i32) {
    %c0_i32 = arith.constant 0 : i32
    %c0_i32_0 = arith.constant 0 : i32
    return %arg0, %c0_i32 : i32, i32
  }
}

</mosaic_0001>

<bundles_post_ra>
// kernel: lasso_regression_forward.1
= control target key start
LH: loop header
LB: loop body
LE: loop exit
PB: predicated region body
PF: predicated region fallthrough
CT: control target
= control target key end

     0   :  { %vm58_vm0 = vcmask 31744   ;;  %s164_s1 = inlined_call_operand.vmem [shape: f32[128,4], index: 1, kind: input, shape index: {}]   ;;  %s165_s0 = inlined_call_operand.vmem [shape: f32[16,128], index: 0, kind: input, shape index: {}]   ;;  %s166_s2 = inlined_call_operand.<no memory space> [shape: f32[1,1], index: 2, kind: input, shape index: {}]   ;;  %s167_s3 = inlined_call_operand.vmem [shape: f32[16,4], index: 3, kind: output, shape index: {}]  }
   0x1   :  { %v32_v0 = vld [vmem:[%s164_s1 + $0x78] sm:$0xff]  ;;  %v31_v1 = vld [vmem:[%s164_s1 + $0x70] sm:$0xff]  ;;  %v30_v2 = vld [vmem:[%s164_s1 + $0x68] sm:$0xff]  ;;  %v34_v18 = vstv %s166_s2 }
   0x2   :  { %35 = vmatpush.msra.mxu0 %v32_v0  ;;  %65 = vmatpush.msra.mxu1 %v32_v0  ;;  %v29_v3 = vld [vmem:[%s164_s1 + $0x60] sm:$0xff]  ;;  %v28_v4 = vld [vmem:[%s164_s1 + $0x58] sm:$0xff]  ;;  %v27_v5 = vld [vmem:[%s164_s1 + $0x50] sm:$0xff] }
   0x3   :  { %v26_v6 = vld [vmem:[%s164_s1 + $0x48] sm:$0xff]  ;;  %v25_v7 = vld [vmem:[%s164_s1 + $0x40] sm:$0xff]  ;;  %v24_v8 = vld [vmem:[%s164_s1 + $0x38] sm:$0xff] }
   0x4   :  { %36 = vmatpush.msra.mxu0 %v31_v1  ;;  %66 = vmatpush.msra.mxu1 %v31_v1  ;;  %v23_v9 = vld [vmem:[%s164_s1 + $0x30] sm:$0xff]  ;;  %v22_v10 = vld [vmem:[%s164_s1 + $0x28] sm:$0xff]  ;;  %v21_v11 = vld [vmem:[%s164_s1 + $0x20] sm:$0xff] }
   0x5   :  { %v20_v12 = vld [vmem:[%s164_s1 + $0x18] sm:$0xff]  ;;  %v19_v13 = vld [vmem:[%s164_s1 + $0x10] sm:$0xff]  ;;  %v18_v14 = vld [vmem:[%s164_s1 + $0x8] sm:$0xff] }
   0x6   :  { %37 = vmatpush.msra.mxu0 %v30_v2  ;;  %67 = vmatpush.msra.mxu1 %v30_v2  ;;  %v17_v15 = vld [vmem:[%s164_s1] sm:$0xff]  ;;  %v16_v17 = vld [vmem:[%s165_s0 + $0x8] sm:$0xff] }
   0x7   :  { %v15_v16 = vld [vmem:[%s165_s0] sm:$0xff] }
   0x8   :  { %38 = vmatpush.msra.mxu0 %v29_v3  ;;  %68 = vmatpush.msra.mxu1 %v29_v3 }
   0xa   :  { %39 = vmatpush.msra.mxu0 %v28_v4  ;;  %69 = vmatpush.msra.mxu1 %v28_v4 }
   0xc   :  { %40 = vmatpush.msra.mxu0 %v27_v5  ;;  %70 = vmatpush.msra.mxu1 %v27_v5 }
   0xe   :  { %41 = vmatpush.msra.mxu0 %v26_v6  ;;  %71 = vmatpush.msra.mxu1 %v26_v6 }
  0x10   :  { %42 = vmatpush.msra.mxu0 %v25_v7  ;;  %72 = vmatpush.msra.mxu1 %v25_v7 }
  0x12   :  { %43 = vmatpush.msra.mxu0 %v24_v8  ;;  %73 = vmatpush.msra.mxu1 %v24_v8 }
  0x14   :  { %44 = vmatpush.msra.mxu0 %v23_v9  ;;  %74 = vmatpush.msra.mxu1 %v23_v9 }
  0x16   :  { %45 = vmatpush.msra.mxu0 %v22_v10  ;;  %75 = vmatpush.msra.mxu1 %v22_v10 }
  0x18   :  { %46 = vmatpush.msra.mxu0 %v21_v11  ;;  %76 = vmatpush.msra.mxu1 %v21_v11 }
  0x1a   :  { %47 = vmatpush.msra.mxu0 %v20_v12  ;;  %77 = vmatpush.msra.mxu1 %v20_v12 }
  0x1c   :  { %48 = vmatpush.msra.mxu0 %v19_v13  ;;  %78 = vmatpush.msra.mxu1 %v19_v13 }
  0x1e   :  { %49 = vmatpush.msra.mxu0 %v18_v14  ;;  %79 = vmatpush.msra.mxu1 %v18_v14 }
  0x20   :  { %50 = vmatpush.msra.mxu0 %v17_v15  ;;  %80 = vmatpush.msra.mxu1 %v17_v15 }
  0x21   :  { %51 = vmatmul.f32.vlgmr.msra.gmra.mxu0 %v15_v16  ;;  %54 = vmatmul.f32.vlgmr.msra.gmra.mxu1 %v16_v17 }
  0x9e   :  { %v52_v19 = vpop.f32.mrf.mxu0  ;;  %v55_v20 = vpop.f32.mrf.mxu1 }
  0x9f   :  { %v53_v21 = vadd.f32 %v52_v19, %v34_v18  ;;  %v56_v22 = vadd.f32 %v55_v20, %v34_v18 }
  0xa1   :  { %59 = vst.msk [vmem:[%s167_s3] sm:$0xff] %vm58_vm0, %v53_v21 }
  0xa2   :  { %60 = vst.msk [vmem:[%s167_s3 + $0x8] sm:$0xff] %vm58_vm0, %v56_v22 }

</bundles_post_ra>
